<compile_context>
chip_gen: v5e
topology: v5e:2x2
jax: 0.10.0
libtpu: 0.0.40
codegen_flags: <defaults>
</compile_context>

<pallas_src>
import functools

import jax
import jax.numpy as jnp
from jax.experimental import pallas as pl
from jax.experimental.pallas import tpu as pltpu


def _encoder_kernel(x_ref, w1_ref, b1_ref, w2_ref, b2_ref, w3_ref, b3_ref,
                    out_ref, *, d_latent):
    """flatten -> fc1 -> ReLU -> (dropout: eval identity) -> fc2 -> ReLU
    -> fc3 (merged 128-lane head) -> lanes [D,2D) get clip(exp(.),1e-5,1e5)."""
    x = x_ref[...].astype(jnp.bfloat16)                      # (TB, 784)

    h1 = jnp.dot(x, w1_ref[...], preferred_element_type=jnp.float32)
    h1 = jnp.maximum(h1 + b1_ref[...], 0.0)                  # (TB, 256) f32
    # TODO(synk): nn.Dropout(p=0.1) in training mode would need pltpu PRNG
    # (prng_seed + stateful_bernoulli); eval-mode identity is used here.
    h1 = h1.astype(jnp.bfloat16)

    h2 = jnp.dot(h1, w2_ref[...], preferred_element_type=jnp.float32)
    h2 = jnp.maximum(h2 + b2_ref[...], 0.0)                  # (TB, 128) f32
    h2 = h2.astype(jnp.bfloat16)

    p = jnp.dot(h2, w3_ref[...], preferred_element_type=jnp.float32)
    p = p + b3_ref[...]                                      # (TB, head_p) f32

    lane = jax.lax.broadcasted_iota(jnp.int32, p.shape, 1)
    is_std = (lane >= d_latent) & (lane < 2 * d_latent)
    std_vals = jnp.clip(jnp.exp(p), 1e-5, 1e5)               # exp on EUP
    out_ref[...] = jnp.where(is_std, std_vals, p)            # single dense vst


def _round_up(n, m):
    return (n + m - 1) // m * m


@functools.partial(jax.jit, static_argnames=("d_latent", "batch_tile"))
def forward_acg_encoder(x_nchw, w1, b1, w2, b2, w3, b3, *, d_latent,
                        batch_tile=1024):
    """Returns (mu, std) parameterizing Normal(mu, std), each (B, d_latent).
    Weights are (in_features, out_features); equivalent to PyTorch x @ W.T."""
    batch = x_nchw.shape[0]
    d_in = x_nchw.shape[1] * x_nchw.shape[2] * x_nchw.shape[3]
    x_flat = x_nchw.reshape(batch, d_in).astype(jnp.float32)   # nn.Flatten

    # Lane-dense hidden / head dims (zero padding is numerically inert).
    h1_p = _round_up(w1.shape[1], 128)       # 250 -> 256
    h2_p = _round_up(w2.shape[1], 128)       # 125 -> 128
    head_p = _round_up(2 * d_latent, 128)    # 32  -> 128 (merged mu|std head)

    # Batch tile: multiple of 8 sublanes; prefer >= 2 grid steps (v7x: 2 TCs).
    tb = _round_up(max(1, min(batch_tile, batch)), 8)
    if batch > 8 and pl.cdiv(batch, tb) < 2:
        tb = _round_up(pl.cdiv(batch, 2), 8)
    b_pad = _round_up(batch, tb)

    # Only the batch dim of x is padded; x stays f32 (cast to bf16 in-kernel)
    # and the feature dim stays at the true 784 (full-extent block is legal).
    x_p = jnp.pad(x_flat, ((0, b_pad - batch), (0, 0)))

    w1_p = jnp.pad(w1, ((0, 0), (0, h1_p - w1.shape[1]))).astype(jnp.bfloat16)
    b1_p = jnp.pad(b1, ((0, 0), (0, h1_p - b1.shape[1])))

    w2_p = jnp.pad(w2, ((0, h1_p - w2.shape[0]),
                        (0, h2_p - w2.shape[1]))).astype(jnp.bfloat16)
    b2_p = jnp.pad(b2, ((0, 0), (0, h2_p - b2.shape[1])))

    w3_p = jnp.pad(w3, ((0, h2_p - w3.shape[0]),
                        (0, head_p - w3.shape[1]))).astype(jnp.bfloat16)
    b3_p = jnp.pad(b3, ((0, 0), (0, head_p - b3.shape[1])))

    grid = (b_pad // tb,)
    const = lambda i: (0, 0)          # weights/biases stay VMEM-resident
    batched = lambda i: (i, 0)        # x / output tiled over batch

    out = pl.pallas_call(
        functools.partial(_encoder_kernel, d_latent=d_latent),
        out_shape=jax.ShapeDtypeStruct((b_pad, head_p), jnp.float32),
        grid=grid,
        in_specs=[
            pl.BlockSpec((tb, d_in), batched),       # x  (f32, full feat dim)
            pl.BlockSpec((d_in, h1_p), const),       # w1
            pl.BlockSpec((1, h1_p), const),          # b1
            pl.BlockSpec((h1_p, h2_p), const),       # w2
            pl.BlockSpec((1, h2_p), const),          # b2
            pl.BlockSpec((h2_p, head_p), const),     # w3 (mu|std merged)
            pl.BlockSpec((1, head_p), const),        # b3
        ],
        out_specs=pl.BlockSpec((tb, head_p), batched),
        compiler_params=pltpu.CompilerParams(
            dimension_semantics=("parallel",),
            vmem_limit_bytes=32 * 1024 * 1024),
    )(x_p, w1_p, b1_p, w2_p, b2_p, w3_p, b3_p)

    mu = out[:batch, :d_latent]
    std = out[:batch, d_latent:2 * d_latent]
    return mu, std


def init_params(key, d_in, d_latent):
    """PyTorch-Linear-style init: U(-1/sqrt(fan_in), 1/sqrt(fan_in)).
    Weights stored as (in_features, out_features)."""
    sizes = [(d_in, 250), (250, 125), (125, 2 * d_latent)]
    params = []
    for (fan_in, fan_out) in sizes:
        key, kw, kb = jax.random.split(key, 3)
        bound = 1.0 / jnp.sqrt(jnp.float32(fan_in))
        w = jax.random.uniform(kw, (fan_in, fan_out), jnp.float32, -bound, bound)
        b = jax.random.uniform(kb, (1, fan_out), jnp.float32, -bound, bound)
        params.extend([w, b])
    return params


def _reference(x_nchw, w1, b1, w2, b2, w3, b3, d_latent):
    """Pure-JAX f32 reference of the PyTorch forward (eval-mode dropout)."""
    x = x_nchw.reshape(x_nchw.shape[0], -1).astype(jnp.float32)
    h1 = jnp.maximum(x @ w1 + b1, 0.0)
    h2 = jnp.maximum(h1 @ w2 + b2, 0.0)
    params = h2 @ w3 + b3
    mu = params[:, :d_latent]
    std = jnp.clip(jnp.exp(params[:, d_latent:]), 1e-5, 1e5)
    return mu, std


if __name__ == "__main__":
    D_LATENT = 16
    BATCH, C, H, W = 2, 1, 28, 28   # module operates on (B, 1, 28, 28)

    key = jax.random.PRNGKey(0)
    key, kx = jax.random.split(key)
    # inputs are "zeros and ones" per the docstring
    x = (jax.random.uniform(kx, (BATCH, C, H, W)) > 0.5).astype(jnp.float32)

    w1, b1, w2, b2, w3, b3 = init_params(key, C * H * W, D_LATENT)

    mu, std = forward_acg_encoder(x, w1, b1, w2, b2, w3, b3,
                                  d_latent=D_LATENT)
    jax.block_until_ready((mu, std))

    mu_ref, std_ref = _reference(x, w1, b1, w2, b2, w3, b3, D_LATENT)

    assert mu.shape == (BATCH, D_LATENT)
    assert std.shape == (BATCH, D_LATENT)
    assert bool(jnp.all(std >= 1e-5)) and bool(jnp.all(std <= 1e5))
    # bf16 matmuls with f32 accumulation: generous tolerance vs f32 reference.
    assert bool(jnp.allclose(mu, mu_ref, atol=2e-2, rtol=2e-2))
    assert bool(jnp.allclose(std, std_ref, atol=2e-2, rtol=2e-2))
    print("KERNEL_OK")
</pallas_src>

<mosaic_0001>
module attributes {stable_mosaic.version = 11 : i64} {
  func.func @_encoder_kernel(%arg0: i32, %arg1: memref<8x784xf32, #tpu.memory_space<vmem>>, %arg2: memref<784x256xbf16, #tpu.memory_space<vmem>>, %arg3: memref<1x256xf32, #tpu.memory_space<vmem>>, %arg4: memref<256x128xbf16, #tpu.memory_space<vmem>>, %arg5: memref<1x128xf32, #tpu.memory_space<vmem>>, %arg6: memref<128x128xbf16, #tpu.memory_space<vmem>>, %arg7: memref<1x128xf32, #tpu.memory_space<vmem>>, %arg8: memref<8x128xf32, #tpu.memory_space<vmem>>) attributes {dimension_semantics = [#tpu.dimension_semantics<parallel>], iteration_bounds = array<i64: 1>, scalar_prefetch = 0 : i64, scratch_operands = 0 : i64, tpu.core_type = #tpu.core_type<tc>, window_params = [{transform_indices = @transform_0, window_bounds = array<i64: 8, 784>}, {pipeline_mode = #tpu.pipeline_mode<synchronous>, transform_indices = @transform_1, window_bounds = array<i64: 784, 256>}, {pipeline_mode = #tpu.pipeline_mode<synchronous>, transform_indices = @transform_2, window_bounds = array<i64: 1, 256>}, {pipeline_mode = #tpu.pipeline_mode<synchronous>, transform_indices = @transform_3, window_bounds = array<i64: 256, 128>}, {pipeline_mode = #tpu.pipeline_mode<synchronous>, transform_indices = @transform_4, window_bounds = array<i64: 1, 128>}, {pipeline_mode = #tpu.pipeline_mode<synchronous>, transform_indices = @transform_5, window_bounds = array<i64: 128, 128>}, {pipeline_mode = #tpu.pipeline_mode<synchronous>, transform_indices = @transform_6, window_bounds = array<i64: 1, 128>}, {transform_indices = @transform_7, window_bounds = array<i64: 8, 128>}]} {
    %c0 = arith.constant 0 : index
    %c0_0 = arith.constant 0 : index
    %0 = vector.load %arg1[%c0, %c0_0] : memref<8x784xf32, #tpu.memory_space<vmem>>, vector<8x784xf32>
    %1 = arith.truncf %0 : vector<8x784xf32> to vector<8x784xbf16>
    %c0_1 = arith.constant 0 : index
    %c0_2 = arith.constant 0 : index
    %2 = vector.load %arg2[%c0_1, %c0_2] : memref<784x256xbf16, #tpu.memory_space<vmem>>, vector<784x256xbf16>
    %cst = arith.constant dense<0.000000e+00> : vector<8x256xf32>
    %3 = tpu.matmul %1, %2, %cst {dimension_numbers = #tpu.dot_dimension_numbers<[1], [0], [0], [1], [0, 0, 1, 1], [], []>} : vector<8x784xbf16>, vector<784x256xbf16>, vector<8x256xf32> -> vector<8x256xf32>
    %c0_3 = arith.constant 0 : index
    %c0_4 = arith.constant 0 : index
    %4 = vector.load %arg3[%c0_3, %c0_4] : memref<1x256xf32, #tpu.memory_space<vmem>>, vector<1x256xf32>
    %5 = vector.broadcast %4 : vector<1x256xf32> to vector<8x256xf32>
    %6 = arith.addf %3, %5 : vector<8x256xf32>
    %cst_5 = arith.constant 0.000000e+00 : f32
    %7 = vector.broadcast %cst_5 : f32 to vector<8x256xf32>
    %8 = arith.maximumf %6, %7 : vector<8x256xf32>
    %9 = arith.truncf %8 : vector<8x256xf32> to vector<8x256xbf16>
    %c0_6 = arith.constant 0 : index
    %c0_7 = arith.constant 0 : index
    %10 = vector.load %arg4[%c0_6, %c0_7] : memref<256x128xbf16, #tpu.memory_space<vmem>>, vector<256x128xbf16>
    %cst_8 = arith.constant dense<0.000000e+00> : vector<8x128xf32>
    %11 = tpu.matmul %9, %10, %cst_8 {dimension_numbers = #tpu.dot_dimension_numbers<[1], [0], [0], [1], [0, 0, 1, 1], [], []>} : vector<8x256xbf16>, vector<256x128xbf16>, vector<8x128xf32> -> vector<8x128xf32>
    %c0_9 = arith.constant 0 : index
    %c0_10 = arith.constant 0 : index
    %12 = vector.load %arg5[%c0_9, %c0_10] : memref<1x128xf32, #tpu.memory_space<vmem>>, vector<1x128xf32>
    %13 = vector.broadcast %12 : vector<1x128xf32> to vector<8x128xf32>
    %14 = arith.addf %11, %13 : vector<8x128xf32>
    %cst_11 = arith.constant 0.000000e+00 : f32
    %15 = vector.broadcast %cst_11 : f32 to vector<8x128xf32>
    %16 = arith.maximumf %14, %15 : vector<8x128xf32>
    %17 = arith.truncf %16 : vector<8x128xf32> to vector<8x128xbf16>
    %c0_12 = arith.constant 0 : index
    %c0_13 = arith.constant 0 : index
    %18 = vector.load %arg6[%c0_12, %c0_13] : memref<128x128xbf16, #tpu.memory_space<vmem>>, vector<128x128xbf16>
    %cst_14 = arith.constant dense<0.000000e+00> : vector<8x128xf32>
    %19 = tpu.matmul %17, %18, %cst_14 {dimension_numbers = #tpu.dot_dimension_numbers<[1], [0], [0], [1], [0, 0, 1, 1], [], []>} : vector<8x128xbf16>, vector<128x128xbf16>, vector<8x128xf32> -> vector<8x128xf32>
    %c0_15 = arith.constant 0 : index
    %c0_16 = arith.constant 0 : index
    %20 = vector.load %arg7[%c0_15, %c0_16] : memref<1x128xf32, #tpu.memory_space<vmem>>, vector<1x128xf32>
    %21 = vector.broadcast %20 : vector<1x128xf32> to vector<8x128xf32>
    %22 = arith.addf %19, %21 : vector<8x128xf32>
    %23 = tpu.iota {dimensions = array<i32: 1>} : vector<8x128xi32>
    %c16_i32 = arith.constant 16 : i32
    %24 = vector.broadcast %c16_i32 : i32 to vector<8x128xi32>
    %25 = arith.cmpi sge, %23, %24 : vector<8x128xi32>
    %c32_i32 = arith.constant 32 : i32
    %26 = vector.broadcast %c32_i32 : i32 to vector<8x128xi32>
    %27 = arith.cmpi slt, %23, %26 : vector<8x128xi32>
    %28 = arith.andi %25, %27 : vector<8x128xi1>
    %29 = math.exp %22 : vector<8x128xf32>
    %cst_17 = arith.constant 9.99999974E-6 : f32
    %cst_18 = arith.constant 1.000000e+05 : f32
    %30 = vector.broadcast %cst_17 : f32 to vector<8x128xf32>
    %31 = arith.maximumf %30, %29 : vector<8x128xf32>
    %32 = vector.broadcast %cst_18 : f32 to vector<8x128xf32>
    %33 = arith.minimumf %32, %31 : vector<8x128xf32>
    %34 = arith.select %28, %33, %22 : vector<8x128xi1>, vector<8x128xf32>
    %c0_19 = arith.constant 0 : index
    %c0_20 = arith.constant 0 : index
    %35 = vector.load %arg8[%c0_19, %c0_20] : memref<8x128xf32, #tpu.memory_space<vmem>>, vector<8x128xf32>
    tpu.vector_store %arg8[%c0_19, %c0_20], %34 {strides = array<i32>} : memref<8x128xf32, #tpu.memory_space<vmem>>, vector<8x128xf32>,
    return
  }
  func.func @transform_0(%arg0: i32) -> (i32, i32) {
    %c0_i32 = arith.constant 0 : i32
    %c0_i32_0 = arith.constant 0 : i32
    return %arg0, %c0_i32 : i32, i32
  }
  func.func @transform_1(%arg0: i32) -> (i32, i32) {
    %c0_i32 = arith.constant 0 : i32
    %c0_i32_0 = arith.constant 0 : i32
    %c0_i32_1 = arith.constant 0 : i32
    return %c0_i32, %c0_i32_0 : i32, i32
  }
  func.func @transform_2(%arg0: i32) -> (i32, i32) {
    %c0_i32 = arith.constant 0 : i32
    %c0_i32_0 = arith.constant 0 : i32
    %c0_i32_1 = arith.constant 0 : i32
    return %c0_i32, %c0_i32_0 : i32, i32
  }
  func.func @transform_3(%arg0: i32) -> (i32, i32) {
    %c0_i32 = arith.constant 0 : i32
    %c0_i32_0 = arith.constant 0 : i32
    %c0_i32_1 = arith.constant 0 : i32
    return %c0_i32, %c0_i32_0 : i32, i32
  }
  func.func @transform_4(%arg0: i32) -> (i32, i32) {
    %c0_i32 = arith.constant 0 : i32
    %c0_i32_0 = arith.constant 0 : i32
    %c0_i32_1 = arith.constant 0 : i32
    return %c0_i32, %c0_i32_0 : i32, i32
  }
  func.func @transform_5(%arg0: i32) -> (i32, i32) {
    %c0_i32 = arith.constant 0 : i32
    %c0_i32_0 = arith.constant 0 : i32
    %c0_i32_1 = arith.constant 0 : i32
    return %c0_i32, %c0_i32_0 : i32, i32
  }
  func.func @transform_6(%arg0: i32) -> (i32, i32) {
    %c0_i32 = arith.constant 0 : i32
    %c0_i32_0 = arith.constant 0 : i32
    %c0_i32_1 = arith.constant 0 : i32
    return %c0_i32, %c0_i32_0 : i32, i32
  }
  func.func @transform_7(%arg0: i32) -> (i32, i32) {
    %c0_i32 = arith.constant 0 : i32
    %c0_i32_0 = arith.constant 0 : i32
    return %arg0, %c0_i32 : i32, i32
  }
}

</mosaic_0001>

<bundles_post_ra>
// kernel: forward_acg_encoder.1
= control target key start
LH: loop header
LB: loop body
LE: loop exit
PB: predicated region body
PF: predicated region fallthrough
CT: control target
= control target key end

     0   :  { %vm635_vm0 = vcmask 130048   ;;  %s2460_s1 = inlined_call_operand.vmem [shape: bf16[784,256], index: 1, kind: input, shape index: {}]   ;;  %s2461_s0 = inlined_call_operand.vmem [shape: f32[8,784], index: 0, kind: input, shape index: {}]   ;;  %s2462_s4 = inlined_call_operand.vmem [shape: f32[1,128], index: 4, kind: input, shape index: {}]   ;;  %s2463_s3 = inlined_call_operand.vmem [shape: bf16[256,128], index: 3, kind: input, shape index: {}]   ;;  %s2464_s2 = inlined_call_operand.vmem [shape: f32[1,256], index: 2, kind: input, shape index: {}]   ;;  %s2465_s6 = inlined_call_operand.vmem [shape: f32[1,128], index: 6, kind: input, shape index: {}]   ;;  %s2466_s5 = inlined_call_operand.vmem [shape: bf16[128,128], index: 5, kind: input, shape index: {}]   ;;  %s2467_s7 = inlined_call_operand.vmem [shape: f32[8,128], index: 7, kind: output, shape index: {}]  }
   0x1   :  { %v1139_v0 = vld [vmem:[%s2460_s1 + $0x70] sm:$0xf]  ;;  %v1586_v1 = vld [vmem:[%s2460_s1 + $0x74] sm:$0xf0]  ;;  %v1131_v11 = vld [vmem:[%s2460_s1 + $0x60] sm:$0xf] }
   0x2   :  { %v1267_v2 = vld [vmem:[%s2460_s1 + $0x170] sm:$0xf]  ;;  %v1140_v3 = vor.u32 %v1586_v1, %v1139_v0  ;;  %v1618_v4 = vld [vmem:[%s2460_s1 + $0x174] sm:$0xf0]  ;;  %v1584_v13 = vld [vmem:[%s2460_s1 + $0x64] sm:$0xf0] }
   0x3   :  { %v1331_v5 = vld [vmem:[%s2460_s1 + $0x1f0] sm:$0xf]  ;;  %v1634_v6 = vld [vmem:[%s2460_s1 + $0x1f4] sm:$0xf0]  ;;  %v1268_v7 = vor.u32 %v1618_v4, %v1267_v2  ;;  %v1259_v14 = vld [vmem:[%s2460_s1 + $0x160] sm:$0xf]  ;;  %v1132_v16 = vor.u32 %v1584_v13, %v1131_v11 }
   0x4   :  { %v1332_v8 = vor.u32 %v1634_v6, %v1331_v5  ;;  %v1203_v9 = vld [vmem:[%s2460_s1 + $0xf0] sm:$0xf]  ;;  %v1602_v10 = vld [vmem:[%s2460_s1 + $0xf4] sm:$0xf0]  ;;  %639 = vmatpush.bf16.msra.mxu0 %v1140_v3  ;;  %v1616_v15 = vld [vmem:[%s2460_s1 + $0x164] sm:$0xf0] }
   0x5   :  { %v1204_v12 = vor.u32 %v1602_v10, %v1203_v9  ;;  %665 = vmatpush.bf16.msra.mxu2 %v1268_v7  ;;  %v1260_v17 = vor.u32 %v1616_v15, %v1259_v14  ;;  %v1323_v18 = vld [vmem:[%s2460_s1 + $0x1e0] sm:$0xf]  ;;  %v1632_v19 = vld [vmem:[%s2460_s1 + $0x1e4] sm:$0xf0]  ;;  %v1123_v23 = vld [vmem:[%s2460_s1 + $0x50] sm:$0xf] }
   0x6   :  { %678 = vmatpush.bf16.msra.mxu3 %v1332_v8  ;;  %v1195_v20 = vld [vmem:[%s2460_s1 + $0xe0] sm:$0xf]  ;;  %v1324_v21 = vor.u32 %v1632_v19, %v1323_v18  ;;  %v1600_v22 = vld [vmem:[%s2460_s1 + $0xe4] sm:$0xf0]  ;;  %v1582_v24 = vld [vmem:[%s2460_s1 + $0x54] sm:$0xf0] }
   0x7   :  { %652 = vmatpush.bf16.msra.mxu1 %v1204_v12  ;;  %v1196_v25 = vor.u32 %v1600_v22, %v1195_v20  ;;  %v1251_v26 = vld [vmem:[%s2460_s1 + $0x150] sm:$0xf]  ;;  %v1614_v27 = vld [vmem:[%s2460_s1 + $0x154] sm:$0xf0]  ;;  %v1124_v29 = vor.u32 %v1582_v24, %v1123_v23  ;;  %v1115_v35 = vld [vmem:[%s2460_s1 + $0x40] sm:$0xf] }
   0x8   :  { %v1315_v28 = vld [vmem:[%s2460_s1 + $0x1d0] sm:$0xf]  ;;  %640 = vmatpush.bf16.msra.mxu0 %v1132_v16  ;;  %v1630_v30 = vld [vmem:[%s2460_s1 + $0x1d4] sm:$0xf0]  ;;  %v1252_v33 = vor.u32 %v1614_v27, %v1251_v26  ;;  %v1580_v36 = vld [vmem:[%s2460_s1 + $0x44] sm:$0xf0] }
   0x9   :  { %v1187_v31 = vld [vmem:[%s2460_s1 + $0xd0] sm:$0xf]  ;;  %v1598_v32 = vld [vmem:[%s2460_s1 + $0xd4] sm:$0xf0]  ;;  %666 = vmatpush.bf16.msra.mxu2 %v1260_v17  ;;  %v1316_v34 = vor.u32 %v1630_v30, %v1315_v28  ;;  %v1243_v37 = vld [vmem:[%s2460_s1 + $0x140] sm:$0xf]  ;;  %v1116_v44 = vor.u32 %v1580_v36, %v1115_v35 }
   0xa   :  { %679 = vmatpush.bf16.msra.mxu3 %v1324_v21  ;;  %v1188_v38 = vor.u32 %v1598_v32, %v1187_v31  ;;  %v1612_v39 = vld [vmem:[%s2460_s1 + $0x144] sm:$0xf0]  ;;  %v1307_v40 = vld [vmem:[%s2460_s1 + $0x1c0] sm:$0xf]  ;;  %v1107_v47 = vld [vmem:[%s2460_s1 + $0x30] sm:$0xf] }
   0xb   :  { %653 = vmatpush.bf16.msra.mxu1 %v1196_v25  ;;  %v1628_v41 = vld [vmem:[%s2460_s1 + $0x1c4] sm:$0xf0]  ;;  %v1179_v42 = vld [vmem:[%s2460_s1 + $0xc0] sm:$0xf]  ;;  %v1244_v45 = vor.u32 %v1612_v39, %v1243_v37  ;;  %v1578_v48 = vld [vmem:[%s2460_s1 + $0x34] sm:$0xf0] }
   0xc   :  { %v1596_v43 = vld [vmem:[%s2460_s1 + $0xc4] sm:$0xf0]  ;;  %641 = vmatpush.bf16.msra.mxu0 %v1124_v29  ;;  %v1308_v46 = vor.u32 %v1628_v41, %v1307_v40  ;;  %v1235_v49 = vld [vmem:[%s2460_s1 + $0x130] sm:$0xf]  ;;  %v1610_v51 = vld [vmem:[%s2460_s1 + $0x134] sm:$0xf0]  ;;  %v1108_v56 = vor.u32 %v1578_v48, %v1107_v47 }
   0xd   :  { %667 = vmatpush.bf16.msra.mxu2 %v1252_v33  ;;  %v1180_v50 = vor.u32 %v1596_v43, %v1179_v42  ;;  %v1299_v52 = vld [vmem:[%s2460_s1 + $0x1b0] sm:$0xf]  ;;  %v1626_v53 = vld [vmem:[%s2460_s1 + $0x1b4] sm:$0xf0]  ;;  %v1236_v57 = vor.u32 %v1610_v51, %v1235_v49  ;;  %v1099_v59 = vld [vmem:[%s2460_s1 + $0x20] sm:$0xf] }
   0xe   :  { %680 = vmatpush.bf16.msra.mxu3 %v1316_v34  ;;  %v1171_v54 = vld [vmem:[%s2460_s1 + $0xb0] sm:$0xf]  ;;  %v1594_v55 = vld [vmem:[%s2460_s1 + $0xb4] sm:$0xf0]  ;;  %v1300_v58 = vor.u32 %v1626_v53, %v1299_v52  ;;  %v1576_v60 = vld [vmem:[%s2460_s1 + $0x24] sm:$0xf0] }
   0xf   :  { %654 = vmatpush.bf16.msra.mxu1 %v1188_v38  ;;  %v1227_v61 = vld [vmem:[%s2460_s1 + $0x120] sm:$0xf]  ;;  %v1172_v62 = vor.u32 %v1594_v55, %v1171_v54  ;;  %v1608_v63 = vld [vmem:[%s2460_s1 + $0x124] sm:$0xf0]  ;;  %v1100_v4 = vor.u32 %v1576_v60, %v1099_v59  ;;  %v1091_v7 = vld [vmem:[%s2460_s1 + $0x10] sm:$0xf] }
  0x10   :  { %642 = vmatpush.bf16.msra.mxu0 %v1116_v44  ;;  %v1291_v0 = vld [vmem:[%s2460_s1 + $0x1a0] sm:$0xf]  ;;  %v1624_v1 = vld [vmem:[%s2460_s1 + $0x1a4] sm:$0xf0]  ;;  %v1228_v5 = vor.u32 %v1608_v63, %v1227_v61  ;;  %v1574_v8 = vld [vmem:[%s2460_s1 + $0x14] sm:$0xf0] }
  0x11   :  { %668 = vmatpush.bf16.msra.mxu2 %v1244_v45  ;;  %v1163_v2 = vld [vmem:[%s2460_s1 + $0xa0] sm:$0xf]  ;;  %v1592_v3 = vld [vmem:[%s2460_s1 + $0xa4] sm:$0xf0]  ;;  %v1292_v6 = vor.u32 %v1624_v1, %v1291_v0  ;;  %v1219_v9 = vld [vmem:[%s2460_s1 + $0x110] sm:$0xf]  ;;  %v1092_v16 = vor.u32 %v1574_v8, %v1091_v7 }
  0x12   :  { %681 = vmatpush.bf16.msra.mxu3 %v1308_v46  ;;  %v1164_v10 = vor.u32 %v1592_v3, %v1163_v2  ;;  %v1606_v11 = vld [vmem:[%s2460_s1 + $0x114] sm:$0xf0]  ;;  %v1283_v12 = vld [vmem:[%s2460_s1 + $0x190] sm:$0xf]  ;;  %v1083_v17 = vld [vmem:[%s2460_s1] sm:$0xf] }
  0x13   :  { %655 = vmatpush.bf16.msra.mxu1 %v1180_v50  ;;  %v1622_v13 = vld [vmem:[%s2460_s1 + $0x194] sm:$0xf0]  ;;  %v1155_v14 = vld [vmem:[%s2460_s1 + $0x90] sm:$0xf]  ;;  %v1572_v18 = vld [vmem:[%s2460_s1 + $0x4] sm:$0xf0]  ;;  %v1220_v20 = vor.u32 %v1606_v11, %v1219_v9 }
  0x14   :  { %643 = vmatpush.bf16.msra.mxu0 %v1108_v56  ;;  %v1590_v15 = vld [vmem:[%s2460_s1 + $0x94] sm:$0xf0]  ;;  %v1211_v19 = vld [vmem:[%s2460_s1 + $0x100] sm:$0xf]  ;;  %v1284_v21 = vor.u32 %v1622_v13, %v1283_v12  ;;  %v1604_v22 = vld [vmem:[%s2460_s1 + $0x104] sm:$0xf0]  ;;  %v1084_v32 = vor.u32 %v1572_v18, %v1083_v17 }
  0x15   :  { %669 = vmatpush.bf16.msra.mxu2 %v1236_v57  ;;  %v1275_v23 = vld [vmem:[%s2460_s1 + $0x180] sm:$0xf]  ;;  %v1620_v24 = vld [vmem:[%s2460_s1 + $0x184] sm:$0xf0]  ;;  %v1156_v25 = vor.u32 %v1590_v15, %v1155_v14  ;;  %v1395_v26 = vld [vmem:[%s2460_s1 + $0x270] sm:$0xf]  ;;  %v1212_v36 = vor.u32 %v1604_v22, %v1211_v19 }
  0x16   :  { %682 = vmatpush.bf16.msra.mxu3 %v1300_v58  ;;  %v1650_v27 = vld [vmem:[%s2460_s1 + $0x274] sm:$0xf0]  ;;  %v1585_v28 = vld [vmem:[%s2460_s1 + $0x74] sm:$0xf]  ;;  %v1141_v29 = vld [vmem:[%s2460_s1 + $0x78] sm:$0xf0]  ;;  %v1276_v37 = vor.u32 %v1620_v24, %v1275_v23 }
  0x17   :  { %656 = vmatpush.bf16.msra.mxu1 %v1172_v62  ;;  %v1147_v30 = vld [vmem:[%s2460_s1 + $0x80] sm:$0xf]  ;;  %v1588_v31 = vld [vmem:[%s2460_s1 + $0x84] sm:$0xf0]  ;;  %v29_v33 = vld [vmem:[%s2461_s0 + $0x10] sm:$0xff]  ;;  %v1396_v41 = vor.u32 %v1650_v27, %v1395_v26  ;;  %v1144_v42 = vor.u32 %v1585_v28, %v1141_v29 }
  0x18   :  { %644 = vmatpush.bf16.msra.mxu0 %v1100_v4  ;;  %v1467_v34 = vld [vmem:[%s2460_s1 + $0x300] sm:$0xf]  ;;  %v1668_v35 = vld [vmem:[%s2460_s1 + $0x304] sm:$0xf0]  ;;  %v1459_v38 = vld [vmem:[%s2460_s1 + $0x2f0] sm:$0xf]  ;;  %v1148_v46 = vor.u32 %v1588_v31, %v1147_v30  ;;  %v1977_v51 = vpack.c.bf16 %v29_v33, %v29_v33 }
  0x19   :  { %670 = vmatpush.bf16.msra.mxu2 %v1228_v5  ;;  %v1666_v39 = vld [vmem:[%s2460_s1 + $0x2f4] sm:$0xf0]  ;;  %v1601_v40 = vld [vmem:[%s2460_s1 + $0xf4] sm:$0xf]  ;;  %v1205_v43 = vld [vmem:[%s2460_s1 + $0xf8] sm:$0xf0]  ;;  %v1468_v47 = vor.u32 %v1668_v35, %v1467_v34 }
  0x1a   :  { %683 = vmatpush.bf16.msra.mxu3 %v1292_v6  ;;  %v1387_v44 = vld [vmem:[%s2460_s1 + $0x260] sm:$0xf]  ;;  %v1648_v48 = vld [vmem:[%s2460_s1 + $0x264] sm:$0xf0]  ;;  %v1583_v49 = vld [vmem:[%s2460_s1 + $0x64] sm:$0xf]  ;;  %v1460_v52 = vor.u32 %v1666_v39, %v1459_v38  ;;  %v1208_v55 = vor.u32 %v1601_v40, %v1205_v43 }
  0x1b   :  { %657 = vmatpush.bf16.msra.mxu1 %v1164_v10  ;;  %v27_v45 = vld [vmem:[%s2461_s0] sm:$0xff]  ;;  %v1133_v50 = vld [vmem:[%s2460_s1 + $0x68] sm:$0xf0]  ;;  %v30_v53 = vld [vmem:[%s2461_s0 + $0x18] sm:$0xff]  ;;  %v1388_v59 = vor.u32 %v1648_v48, %v1387_v44 }
  0x1c   :  { %645 = vmatpush.bf16.msra.mxu0 %v1092_v16  ;;  %v28_v54 = vld [vmem:[%s2461_s0 + $0x8] sm:$0xff]  ;;  %v1985_v56 = vpack.c.bf16 %v27_v45, %v27_v45  ;;  %v1451_v57 = vld [vmem:[%s2460_s1 + $0x2e0] sm:$0xf]  ;;  %v1136_v60 = vor.u32 %v1583_v49, %v1133_v50  ;;  %v1599_v61 = vld [vmem:[%s2460_s1 + $0xe4] sm:$0xf]  ;;  %v2002_v0 = vpack.c.bf16 %v30_v53, %v30_v53 }
  0x1d   :  { %671 = vmatpush.bf16.msra.mxu2 %v1220_v20  ;;  %v1664_v58 = vld [vmem:[%s2460_s1 + $0x2e4] sm:$0xf0]  ;;  %v1197_v62 = vld [vmem:[%s2460_s1 + $0xe8] sm:$0xf0]  ;;  %v1379_v63 = vld [vmem:[%s2460_s1 + $0x250] sm:$0xf]  ;;  %v2004_v1 = vpack.c.bf16 %v28_v54, %v28_v54 }
  0x1e   :  { %684 = vmatpush.bf16.msra.mxu3 %v1284_v21  ;;  %v1646_v2 = vld [vmem:[%s2460_s1 + $0x254] sm:$0xf0]  ;;  %v1581_v3 = vld [vmem:[%s2460_s1 + $0x54] sm:$0xf]  ;;  %v1125_v4 = vld [vmem:[%s2460_s1 + $0x58] sm:$0xf0]  ;;  %v1452_v5 = vor.u32 %v1664_v58, %v1451_v57  ;;  %v1200_v6 = vor.u32 %v1599_v61, %v1197_v62 }
  0x1f   :  { %658 = vmatpush.bf16.msra.mxu1 %v1156_v25  ;;  %v1443_v7 = vld [vmem:[%s2460_s1 + $0x2d0] sm:$0xf]  ;;  %v1662_v8 = vld [vmem:[%s2460_s1 + $0x2d4] sm:$0xf0]  ;;  %v1380_v9 = vor.u32 %v1646_v2, %v1379_v63  ;;  %v1128_v10 = vor.u32 %v1581_v3, %v1125_v4  ;;  %v1597_v11 = vld [vmem:[%s2460_s1 + $0xd4] sm:$0xf] }
  0x20   :  { %646 = vmatpush.bf16.msra.mxu0 %v1084_v32  ;;  %v1189_v12 = vld [vmem:[%s2460_s1 + $0xd8] sm:$0xf0]  ;;  %v1371_v13 = vld [vmem:[%s2460_s1 + $0x240] sm:$0xf]  ;;  %v1644_v14 = vld [vmem:[%s2460_s1 + $0x244] sm:$0xf0]  ;;  %v1444_v17 = vor.u32 %v1662_v8, %v1443_v7 }
  0x21   :  { %672 = vmatpush.bf16.msra.mxu2 %v1212_v36  ;;  %v1579_v15 = vld [vmem:[%s2460_s1 + $0x44] sm:$0xf]  ;;  %v1117_v16 = vld [vmem:[%s2460_s1 + $0x48] sm:$0xf0]  ;;  %v1192_v18 = vor.u32 %v1597_v11, %v1189_v12  ;;  %v1435_v19 = vld [vmem:[%s2460_s1 + $0x2c0] sm:$0xf]  ;;  %v1372_v21 = vor.u32 %v1644_v14, %v1371_v13 }
  0x22   :  { %685 = vmatpush.bf16.msra.mxu3 %v1276_v37  ;;  %v1660_v20 = vld [vmem:[%s2460_s1 + $0x2c4] sm:$0xf0]  ;;  %v1120_v22 = vor.u32 %v1579_v15, %v1117_v16  ;;  %v1595_v23 = vld [vmem:[%s2460_s1 + $0xc4] sm:$0xf]  ;;  %v1181_v24 = vld [vmem:[%s2460_s1 + $0xc8] sm:$0xf0] }
  0x23   :  { %659 = vmatpush.bf16.msra.mxu1 %v1148_v46  ;;  %647 = vmatmul.bf16.vlgmr.msra.gmra.mxu0 %v1985_v56  ;;  %v1363_v25 = vld [vmem:[%s2460_s1 + $0x230] sm:$0xf]  ;;  %v1642_v26 = vld [vmem:[%s2460_s1 + $0x234] sm:$0xf0]  ;;  %v1577_v27 = vld [vmem:[%s2460_s1 + $0x34] sm:$0xf]  ;;  %v1436_v29 = vor.u32 %v1660_v20, %v1435_v19  ;;  %v1184_v30 = vor.u32 %v1595_v23, %v1181_v24 }
  0x24   :  { %691 = vmatpush.bf16.msrb.mxu0 %v1396_v41  ;;  %673 = vmatmul.bf16.vlgmr.msra.gmra.mxu2 %v1977_v51  ;;  %v1109_v28 = vld [vmem:[%s2460_s1 + $0x38] sm:$0xf0]  ;;  %v1427_v31 = vld [vmem:[%s2460_s1 + $0x2b0] sm:$0xf]  ;;  %v1658_v32 = vld [vmem:[%s2460_s1 + $0x2b4] sm:$0xf0]  ;;  %v1364_v34 = vor.u32 %v1642_v26, %v1363_v25 }
  0x25   :  { %724 = vmatpush.bf16.msrb.mxu2 %v1468_v47  ;;  %686 = vmatmul.bf16.vlgmr.msra.gmra.mxu3 %v2002_v0  ;;  %v33_v33 = vld [vmem:[%s2461_s0 + $0x30] sm:$0xff]  ;;  %v1112_v35 = vor.u32 %v1577_v27, %v1109_v28  ;;  %v1173_v37 = vld [vmem:[%s2460_s1 + $0xb8] sm:$0xf0]  ;;  %v1355_v38 = vld [vmem:[%s2460_s1 + $0x220] sm:$0xf] }
  0x26   :  { %730 = vmatpush.bf16.msrb.mxu3 %v1144_v42  ;;  %660 = vmatmul.bf16.vlgmr.msra.gmra.mxu1 %v2004_v1  ;;  %v1593_v36 = vld [vmem:[%s2460_s1 + $0xb4] sm:$0xf]  ;;  %v1640_v39 = vld [vmem:[%s2460_s1 + $0x224] sm:$0xf0]  ;;  %v1575_v40 = vld [vmem:[%s2460_s1 + $0x24] sm:$0xf]  ;;  %v1428_v42 = vor.u32 %v1658_v32, %v1427_v31  ;;  %v2094_v43 = vpack.c.bf16 %v33_v33, %v33_v33 }
  0x27   :  { %704 = vmatpush.bf16.msrb.mxu1 %v1460_v52  ;;  %v1101_v41 = vld [vmem:[%s2460_s1 + $0x28] sm:$0xf0]  ;;  %v1176_v44 = vor.u32 %v1593_v36, %v1173_v37  ;;  %v1419_v45 = vld [vmem:[%s2460_s1 + $0x2a0] sm:$0xf]  ;;  %v1656_v46 = vld [vmem:[%s2460_s1 + $0x2a4] sm:$0xf0]  ;;  %v1356_v47 = vor.u32 %v1640_v39, %v1355_v38 }
  0x28   :  { %692 = vmatpush.bf16.msrb.mxu0 %v1388_v59  ;;  %v1104_v48 = vor.u32 %v1575_v40, %v1101_v41  ;;  %v1591_v49 = vld [vmem:[%s2460_s1 + $0xa4] sm:$0xf]  ;;  %v1165_v50 = vld [vmem:[%s2460_s1 + $0xa8] sm:$0xf0]  ;;  %v1347_v52 = vld [vmem:[%s2460_s1 + $0x210] sm:$0xf]  ;;  %v1420_v57 = vor.u32 %v1656_v46, %v1419_v45 }
  0x29   :  { %743 = vmatpush.bf16.msra.mxu2 %v1208_v55  ;;  %v1638_v53 = vld [vmem:[%s2460_s1 + $0x214] sm:$0xf0]  ;;  %v1573_v54 = vld [vmem:[%s2460_s1 + $0x14] sm:$0xf]  ;;  %v1093_v55 = vld [vmem:[%s2460_s1 + $0x18] sm:$0xf0]  ;;  %v1168_v58 = vor.u32 %v1591_v49, %v1165_v50 }
  0x2a   :  { %731 = vmatpush.bf16.msrb.mxu3 %v1136_v60  ;;  %v1411_v59 = vld [vmem:[%s2460_s1 + $0x290] sm:$0xf]  ;;  %v1654_v60 = vld [vmem:[%s2460_s1 + $0x294] sm:$0xf0]  ;;  %v1589_v61 = vld [vmem:[%s2460_s1 + $0x94] sm:$0xf]  ;;  %v1348_v62 = vor.u32 %v1638_v53, %v1347_v52  ;;  %v1096_v63 = vor.u32 %v1573_v54, %v1093_v55 }
  0x2b   :  { %705 = vmatpush.bf16.msrb.mxu1 %v1452_v5  ;;  %v1157_v2 = vld [vmem:[%s2460_s1 + $0x98] sm:$0xf0]  ;;  %v1339_v3 = vld [vmem:[%s2460_s1 + $0x200] sm:$0xf]  ;;  %v1636_v4 = vld [vmem:[%s2460_s1 + $0x204] sm:$0xf0]  ;;  %v1412_v8 = vor.u32 %v1654_v60, %v1411_v59 }
  0x2c   :  { %693 = vmatpush.bf16.msrb.mxu0 %v1380_v9  ;;  %v1571_v5 = vld [vmem:[%s2460_s1 + $0x4] sm:$0xf]  ;;  %v1617_v7 = vld [vmem:[%s2460_s1 + $0x174] sm:$0xf]  ;;  %v1269_v9 = vld [vmem:[%s2460_s1 + $0x178] sm:$0xf0]  ;;  %v1160_v12 = vor.u32 %v1589_v61, %v1157_v2  ;;  %v1340_v16 = vor.u32 %v1636_v4, %v1339_v3 }
  0x2d   :  { %744 = vmatpush.bf16.msra.mxu2 %v1200_v6  ;;  %v1085_v6 = vld [vmem:[%s2460_s1 + $0x8] sm:$0xf0]  ;;  %v1397_v11 = vld [vmem:[%s2460_s1 + $0x278] sm:$0xf0]  ;;  %v1403_v13 = vld [vmem:[%s2460_s1 + $0x280] sm:$0xf] }
  0x2e   :  { %732 = vmatpush.bf16.msrb.mxu3 %v1128_v10  ;;  %v1649_v10 = vld [vmem:[%s2460_s1 + $0x274] sm:$0xf]  ;;  %v1652_v14 = vld [vmem:[%s2460_s1 + $0x284] sm:$0xf0]  ;;  %v31_v15 = vld [vmem:[%s2461_s0 + $0x20] sm:$0xff] }
  0x2f   :  { %706 = vmatpush.bf16.msrb.mxu1 %v1444_v17  ;;  %v1088_v17 = vor.u32 %v1571_v5, %v1085_v6  ;;  %v1149_v19 = vld [vmem:[%s2460_s1 + $0x88] sm:$0xf0]  ;;  %v1633_v20 = vld [vmem:[%s2460_s1 + $0x1f4] sm:$0xf]  ;;  %v1333_v23 = vld [vmem:[%s2460_s1 + $0x1f8] sm:$0xf0]  ;;  %v1404_v26 = vor.u32 %v1652_v14, %v1403_v13 }
  0x30   :  { %694 = vmatpush.bf16.msrb.mxu0 %v1372_v21  ;;  %v1272_v21 = vor.u32 %v1617_v7, %v1269_v9  ;;  %v1665_v24 = vld [vmem:[%s2460_s1 + $0x2f4] sm:$0xf]  ;;  %v1461_v25 = vld [vmem:[%s2460_s1 + $0x2f8] sm:$0xf0]  ;;  %v32_v27 = vld [vmem:[%s2461_s0 + $0x28] sm:$0xff] }
  0x31   :  { %745 = vmatpush.bf16.msra.mxu2 %v1192_v18  ;;  %v1587_v18 = vld [vmem:[%s2460_s1 + $0x84] sm:$0xf]  ;;  %v1389_v33 = vld [vmem:[%s2460_s1 + $0x268] sm:$0xf0]  ;;  %v2205_v37 = vpack.c.bf16 %v32_v27, %v32_v27  ;;  %v1253_v45 = vld [vmem:[%s2460_s1 + $0x158] sm:$0xf0] }
  0x32   :  { %733 = vmatpush.bf16.msrb.mxu3 %v1120_v22  ;;  %v1400_v22 = vor.u32 %v1649_v10, %v1397_v11  ;;  %v1615_v28 = vld [vmem:[%s2460_s1 + $0x164] sm:$0xf]  ;;  %v1152_v31 = vor.u32 %v1587_v18, %v1149_v19  ;;  %v1325_v39 = vld [vmem:[%s2460_s1 + $0x1e8] sm:$0xf0]  ;;  %v1645_v46 = vld [vmem:[%s2460_s1 + $0x254] sm:$0xf] }
  0x33   :  { %707 = vmatpush.bf16.msrb.mxu1 %v1436_v29  ;;  %v1261_v29 = vld [vmem:[%s2460_s1 + $0x168] sm:$0xf0]  ;;  %v1647_v32 = vld [vmem:[%s2460_s1 + $0x264] sm:$0xf]  ;;  %v1629_v50 = vld [vmem:[%s2460_s1 + $0x1d4] sm:$0xf] }
  0x34   :  { %695 = vmatpush.bf16.msrb.mxu0 %v1364_v34  ;;  %1473 = vmatmul.msk.bf16.vlgmr.msrb.gmra.mxu2 %vm635_vm0, %v2094_v43  ;;  %v1336_v34 = vor.u32 %v1633_v20, %v1333_v23  ;;  %v1631_v36 = vld [vmem:[%s2460_s1 + $0x1e4] sm:$0xf]  ;;  %v1264_v38 = vor.u32 %v1615_v28, %v1261_v29  ;;  %v1453_v41 = vld [vmem:[%s2460_s1 + $0x2e8] sm:$0xf0]  ;;  %v1317_v53 = vld [vmem:[%s2460_s1 + $0x1d8] sm:$0xf0] }
  0x35   :  { %746 = vmatpush.bf16.msra.mxu2 %v1184_v30  ;;  %v2194_v30 = vpack.c.bf16 %v31_v15, %v31_v15  ;;  %v1663_v40 = vld [vmem:[%s2460_s1 + $0x2e4] sm:$0xf]  ;;  %v1661_v54 = vld [vmem:[%s2460_s1 + $0x2d4] sm:$0xf]  ;;  %v1445_v55 = vld [vmem:[%s2460_s1 + $0x2d8] sm:$0xf0] }
  0x36   :  { %734 = vmatpush.bf16.msrb.mxu3 %v1112_v35  ;;  %v1464_v35 = vor.u32 %v1665_v24, %v1461_v25  ;;  %v1456_v49 = vor.u32 %v1663_v40, %v1453_v41  ;;  %v1245_v59 = vld [vmem:[%s2460_s1 + $0x148] sm:$0xf0]  ;;  %v1643_v60 = vld [vmem:[%s2460_s1 + $0x244] sm:$0xf]  ;;  %v1609_v6 = vld [vmem:[%s2460_s1 + $0x134] sm:$0xf] }
  0x37   :  { %708 = vmatpush.bf16.msrb.mxu1 %v1428_v42  ;;  %v1392_v42 = vor.u32 %v1647_v32, %v1389_v33  ;;  %v1373_v61 = vld [vmem:[%s2460_s1 + $0x248] sm:$0xf0]  ;;  %v1659_v4 = vld [vmem:[%s2460_s1 + $0x2c4] sm:$0xf]  ;;  %v1237_v7 = vld [vmem:[%s2460_s1 + $0x138] sm:$0xf0] }
  0x38   :  { %696 = vmatpush.bf16.msrb.mxu0 %v1356_v47  ;;  %v1381_v47 = vld [vmem:[%s2460_s1 + $0x258] sm:$0xf0]  ;;  %v1309_v3 = vld [vmem:[%s2460_s1 + $0x1c8] sm:$0xf0]  ;;  %v1376_v5 = vor.u32 %v1643_v60, %v1373_v61  ;;  %v1240_v13 = vor.u32 %v1609_v6, %v1237_v7  ;;  %v1657_v15 = vld [vmem:[%s2460_s1 + $0x2b4] sm:$0xf] }
  0x39   :  { %747 = vmatpush.bf16.msra.mxu2 %v1176_v44  ;;  %v1613_v44 = vld [vmem:[%s2460_s1 + $0x154] sm:$0xf]  ;;  %v1365_v9 = vld [vmem:[%s2460_s1 + $0x238] sm:$0xf0]  ;;  %v1607_v18 = vld [vmem:[%s2460_s1 + $0x124] sm:$0xf] }
  0x3a   :  { %735 = vmatpush.bf16.msrb.mxu3 %v1104_v48  ;;  %v1328_v48 = vor.u32 %v1631_v36, %v1325_v39  ;;  %v1256_v52 = vor.u32 %v1613_v44, %v1253_v45  ;;  %v1301_v14 = vld [vmem:[%s2460_s1 + $0x1b8] sm:$0xf0]  ;;  %v1229_v19 = vld [vmem:[%s2460_s1 + $0x128] sm:$0xf0]  ;;  %v1639_v20 = vld [vmem:[%s2460_s1 + $0x224] sm:$0xf] }
  0x3b   :  { %709 = vmatpush.bf16.msrb.mxu1 %v1420_v57  ;;  %v1384_v57 = vor.u32 %v1645_v46, %v1381_v47  ;;  %v1623_v24 = vld [vmem:[%s2460_s1 + $0x1a4] sm:$0xf]  ;;  %v1232_v25 = vor.u32 %v1607_v18, %v1229_v19  ;;  %v1421_v28 = vld [vmem:[%s2460_s1 + $0x2a8] sm:$0xf0]  ;;  %v1221_v32 = vld [vmem:[%s2460_s1 + $0x118] sm:$0xf0] }
  0x3c   :  { %697 = vmatpush.bf16.msrb.mxu0 %v1348_v62  ;;  %v1448_v62 = vor.u32 %v1661_v54, %v1445_v55  ;;  %v1655_v27 = vld [vmem:[%s2460_s1 + $0x2a4] sm:$0xf]  ;;  %v1637_v33 = vld [vmem:[%s2460_s1 + $0x214] sm:$0xf]  ;;  %v1285_v40 = vld [vmem:[%s2460_s1 + $0x198] sm:$0xf0] }
  0x3d   :  { %748 = vmatpush.bf16.msra.mxu2 %v1168_v58  ;;  %v1611_v58 = vld [vmem:[%s2460_s1 + $0x144] sm:$0xf]  ;;  %v1424_v36 = vor.u32 %v1655_v27, %v1421_v28  ;;  %v1653_v41 = vld [vmem:[%s2460_s1 + $0x294] sm:$0xf]  ;;  %v1213_v46 = vld [vmem:[%s2460_s1 + $0x108] sm:$0xf0] }
  0x3e   :  { %736 = vmatpush.bf16.msrb.mxu3 %v1096_v63  ;;  %v1627_v63 = vld [vmem:[%s2460_s1 + $0x1c4] sm:$0xf]  ;;  %v1248_v2 = vor.u32 %v1611_v58, %v1245_v59  ;;  %v1277_v54 = vld [vmem:[%s2460_s1 + $0x188] sm:$0xf0]  ;;  %v139_v6 = vld [vmem:[%s2464_s2] sm:$0x3] }
  0x3f   :  { %710 = vmatpush.bf16.msrb.mxu1 %v1412_v8  ;;  %v1641_v8 = vld [vmem:[%s2460_s1 + $0x234] sm:$0xf]  ;;  %v1312_v10 = vor.u32 %v1627_v63, %v1309_v3  ;;  %v1603_v45 = vld [vmem:[%s2460_s1 + $0x104] sm:$0xf]  ;;  %v1405_v58 = vld [vmem:[%s2460_s1 + $0x288] sm:$0xf0] }
  0x40   :  { %698 = vmatpush.bf16.msrb.mxu0 %v1340_v16  ;;  %v1429_v16 = vld [vmem:[%s2460_s1 + $0x2b8] sm:$0xf0]  ;;  %v1635_v47 = vld [vmem:[%s2460_s1 + $0x204] sm:$0xf]  ;;  %v1469_v60 = vld [vmem:[%s2460_s1 + $0x308] sm:$0xf0] }
  0x41   :  { %749 = vmatpush.bf16.msra.mxu2 %v1160_v12  ;;  %v1625_v12 = vld [vmem:[%s2460_s1 + $0x1b4] sm:$0xf]  ;;  %v1432_v23 = vor.u32 %v1657_v15, %v1429_v16  ;;  %v1667_v59 = vld [vmem:[%s2460_s1 + $0x304] sm:$0xf]  ;;  %v1676_v63 = vld [vmem:[%s2463_s3 + $0x38] sm:$0xff] }
  0x42   :  { %737 = vmatpush.bf16.msrb.mxu3 %v1088_v17  ;;  %v1368_v17 = vor.u32 %v1641_v8, %v1365_v9 }
  0x43   :  { %711 = vmatpush.bf16.msrb.mxu1 %v1404_v26  ;;  %699 = vmatmul.bf16.vlgmr.msrb.gmra.mxu0 %v2194_v30  ;;  %v1293_v26 = vld [vmem:[%s2460_s1 + $0x1a8] sm:$0xf0] }
  0x44   :  { %756 = vmatpush.bf16.msra.mxu0 %v1272_v21  ;;  %v1357_v21 = vld [vmem:[%s2460_s1 + $0x228] sm:$0xf0] }
  0x45   :  { %750 = vmatpush.bf16.msra.mxu2 %v1152_v31  ;;  %738 = vmatmul.bf16.vlgmr.msrb.gmra.mxu3 %v1985_v56  ;;  %v1437_v56 = vld [vmem:[%s2460_s1 + $0x2c8] sm:$0xf0]  ;;  %v1360_v29 = vor.u32 %v1639_v20, %v1357_v21  ;;  %v1605_v31 = vld [vmem:[%s2460_s1 + $0x114] sm:$0xf] }
  0x46   :  { %782 = vmatpush.bf16.msra.mxu3 %v1400_v22  ;;  %712 = vmatmul.bf16.vlgmr.msrb.gmra.mxu1 %v2205_v37  ;;  %v1440_v11 = vor.u32 %v1659_v4, %v1437_v56  ;;  %v1304_v22 = vor.u32 %v1625_v12, %v1301_v14  ;;  %v1224_v39 = vor.u32 %v1605_v31, %v1221_v32  ;;  %v1669_v56 = vld [vmem:[%s2463_s3] sm:$0xff] }
  0x47   :  { %769 = vmatpush.bf16.msra.mxu1 %v1336_v34  ;;  %v1349_v34 = vld [vmem:[%s2460_s1 + $0x218] sm:$0xf0] }
  0x48   :  { %757 = vmatpush.bf16.msra.mxu0 %v1264_v38  ;;  %751 = vmatmul.bf16.vlgmr.msra.gmra.mxu2 %v2004_v1  ;;  %v1320_v1 = vor.u32 %v1629_v50, %v1317_v53  ;;  %v1621_v38 = vld [vmem:[%s2460_s1 + $0x194] sm:$0xf]  ;;  %v1352_v44 = vor.u32 %v1637_v33, %v1349_v34  ;;  %v1619_v53 = vld [vmem:[%s2460_s1 + $0x184] sm:$0xf] }
  0x49   :  { %795 = vmatpush.bf16.msrb.mxu2 %v1464_v35  ;;  %v1296_v35 = vor.u32 %v1623_v24, %v1293_v26  ;;  %v1280_v61 = vor.u32 %v1619_v53, %v1277_v54  ;;  %v1682_v26 = vld [vmem:[%s2463_s3 + $0x68] sm:$0xff] }
  0x4a   :  { %783 = vmatpush.bf16.msra.mxu3 %v1392_v42  ;;  %v1413_v42 = vld [vmem:[%s2460_s1 + $0x298] sm:$0xf0] }
  0x4b   :  { %770 = vmatpush.bf16.msra.mxu1 %v1328_v48  ;;  %v1341_v48 = vld [vmem:[%s2460_s1 + $0x208] sm:$0xf0]  ;;  %v1416_v50 = vor.u32 %v1653_v41, %v1413_v42  ;;  %v1677_v41 = vld [vmem:[%s2463_s3 + $0x40] sm:$0xff] }
  0x4c   :  { %758 = vmatpush.bf16.msra.mxu0 %v1256_v52  ;;  %v1216_v52 = vor.u32 %v1603_v45, %v1213_v46  ;;  %v1344_v55 = vor.u32 %v1635_v47, %v1341_v48  ;;  %v142_v45 = vperm.slane %v139_v6, 1 }
  0x4d   :  { %796 = vmatpush.bf16.msrb.mxu2 %v1456_v49  ;;  %v1288_v49 = vor.u32 %v1621_v38, %v1285_v40  ;;  %v1678_v40 = vld [vmem:[%s2463_s3 + $0x48] sm:$0xff] }
  0x4e   :  { %784 = vmatpush.bf16.msra.mxu3 %v1384_v57  ;;  %v1651_v57 = vld [vmem:[%s2460_s1 + $0x284] sm:$0xf] }
  0x4f   :  { %771 = vmatpush.bf16.msra.mxu1 %v1320_v1  ;;  %v1408_v1 = vor.u32 %v1651_v57, %v1405_v58 }
  0x50   :  { %759 = vmatpush.bf16.msra.mxu0 %v1248_v2  ;;  %v1670_v2 = vld [vmem:[%s2463_s3 + $0x8] sm:$0xff] }
  0x51   :  { %797 = vmatpush.bf16.msrb.mxu2 %v1448_v62  ;;  %v1472_v62 = vor.u32 %v1667_v59, %v1469_v60 }
  0x52   :  { %785 = vmatpush.bf16.msra.mxu3 %v1376_v5 }
  0x53   :  { %772 = vmatpush.bf16.msra.mxu1 %v1312_v10  ;;  %v141_v10 = vperm.slane %v139_v6, 0  ;;  %v1693_v6 = vld [vmem:[%s2462_s4] ss:$0 sm:$0xff] }
  0x54   :  { %760 = vmatpush.bf16.msra.mxu0 %v1240_v13 }
  0x55   :  { %798 = vmatpush.bf16.msrb.mxu2 %v1440_v11 }
  0x56   :  { %786 = vmatpush.bf16.msra.mxu3 %v1368_v17  ;;  %v1684_v17 = vld [vmem:[%s2463_s3 + $0x78] sm:$0xff] }
  0x57   :  { %773 = vmatpush.bf16.msra.mxu1 %v1304_v22  ;;  %v1683_v22 = vld [vmem:[%s2463_s3 + $0x70] sm:$0xff] }
  0x58   :  { %761 = vmatpush.bf16.msra.mxu0 %v1232_v25 }
  0x59   :  { %799 = vmatpush.bf16.msrb.mxu2 %v1432_v23 }
  0x5a   :  { %787 = vmatpush.bf16.msra.mxu3 %v1360_v29  ;;  %v1681_v29 = vld [vmem:[%s2463_s3 + $0x60] sm:$0xff] }
  0x5b   :  { %774 = vmatpush.bf16.msra.mxu1 %v1296_v35  ;;  %v1680_v35 = vld [vmem:[%s2463_s3 + $0x58] sm:$0xff] }
  0x5c   :  { %762 = vmatpush.bf16.msra.mxu0 %v1224_v39 }
  0x5d   :  { %800 = vmatpush.bf16.msrb.mxu2 %v1424_v36  ;;  %v1679_v36 = vld [vmem:[%s2463_s3 + $0x50] sm:$0xff] }
  0x5e   :  { %788 = vmatpush.bf16.msra.mxu3 %v1352_v44 }
  0x5f   :  { %775 = vmatpush.bf16.msra.mxu1 %v1288_v49 }
  0x60   :  { %763 = vmatpush.bf16.msra.mxu0 %v1216_v52 }
  0x61   :  { %801 = vmatpush.bf16.msrb.mxu2 %v1416_v50 }
  0x62   :  { %789 = vmatpush.bf16.msra.mxu3 %v1344_v55 }
  0x63   :  { %776 = vmatpush.bf16.msra.mxu1 %v1280_v61  ;;  %764 = vmatmul.bf16.vlgmr.msra.gmra.mxu0 %v1977_v51  ;;  %v1675_v51 = vld [vmem:[%s2463_s3 + $0x30] sm:$0xff] }
  0x65   :  { %790 = vmatmul.bf16.vlgmr.msra.gmra.mxu3 %v2194_v30  ;;  %802 = vmatpush.bf16.msrb.mxu2 %v1408_v1  ;;  %v1674_v30 = vld [vmem:[%s2463_s3 + $0x28] sm:$0xff] }
  0x66   :  { %777 = vmatmul.bf16.vlgmr.msra.gmra.mxu1 %v2002_v0  ;;  %v1673_v0 = vld [vmem:[%s2463_s3 + $0x20] sm:$0xff]  ;;  %970 = vmatpush.bf16.msrb.mxu3 %v1684_v17 }
  0x67   :  { %957 = vmatpush.bf16.msrb.mxu1 %v1676_v63 }
  0x68   :  { %803 = vmatmul.bf16.vlgmr.msrb.gmra.mxu2 %v2205_v37  ;;  %v1671_v37 = vld [vmem:[%s2463_s3 + $0x10] sm:$0xff] }
  0x69   :  { %815 = vmatpush.bf16.msra.mxu2 %v1472_v62 }
  0x6a   :  { %971 = vmatpush.bf16.msrb.mxu3 %v1683_v22 }
  0x6b   :  { %958 = vmatpush.bf16.msrb.mxu1 %v1675_v51  ;;  %v1692_v51 = vld [vmem:[%s2466_s5 + $0x38] sm:$0xff] }
  0x6c   :  { %1053 = vmatpush.bf16.msrb.mxu0 %v1692_v51 }
  0x6e   :  { %972 = vmatpush.bf16.msrb.mxu3 %v1682_v26 }
  0x6f   :  { %959 = vmatpush.bf16.msrb.mxu1 %v1674_v30  ;;  %v1691_v30 = vld [vmem:[%s2466_s5 + $0x30] sm:$0xff] }
  0x70   :  { %1054 = vmatpush.bf16.msrb.mxu0 %v1691_v30 }
  0x72   :  { %973 = vmatpush.bf16.msrb.mxu3 %v1681_v29 }
  0x73   :  { %960 = vmatpush.bf16.msrb.mxu1 %v1673_v0  ;;  %v1690_v0 = vld [vmem:[%s2466_s5 + $0x28] sm:$0xff] }
  0x74   :  { %1055 = vmatpush.bf16.msrb.mxu0 %v1690_v0 }
  0x76   :  { %974 = vmatpush.bf16.msrb.mxu3 %v1680_v35 }
  0x78   :  { %1474 = vmatmul.msk.bf16.vlgmr.msra.gmra.mxu2 %vm635_vm0, %v2094_v43  ;;  %v1672_v43 = vld [vmem:[%s2463_s3 + $0x18] sm:$0xff] }
  0x79   :  { %961 = vmatpush.bf16.msrb.mxu1 %v1672_v43  ;;  %v1689_v43 = vld [vmem:[%s2466_s5 + $0x20] sm:$0xff] }
  0x7a   :  { %975 = vmatpush.bf16.msrb.mxu3 %v1679_v36  ;;  %1056 = vmatpush.bf16.msrb.mxu0 %v1689_v43 }
  0x7d   :  { %962 = vmatpush.bf16.msrb.mxu1 %v1671_v37  ;;  %v1688_v37 = vld [vmem:[%s2466_s5 + $0x18] sm:$0xff] }
  0x7e   :  { %976 = vmatpush.bf16.msrb.mxu3 %v1678_v40  ;;  %1057 = vmatpush.bf16.msrb.mxu0 %v1688_v37 }
  0x81   :  { %963 = vmatpush.bf16.msrb.mxu1 %v1670_v2  ;;  %v1687_v2 = vld [vmem:[%s2466_s5 + $0x10] sm:$0xff] }
  0x82   :  { %977 = vmatpush.bf16.msrb.mxu3 %v1677_v41  ;;  %1058 = vmatpush.bf16.msrb.mxu0 %v1687_v2 }
  0x85   :  { %964 = vmatpush.bf16.msrb.mxu1 %v1669_v56  ;;  %v1686_v56 = vld [vmem:[%s2466_s5 + $0x8] sm:$0xff] }
  0x86   :  { %1059 = vmatpush.bf16.msrb.mxu0 %v1686_v56 }
  0xa0   :  { %v648_v3 = vpop.f32.mrf.mxu0 }
  0xa1   :  { %v649_v12 = vadd.f32 %v648_v3, %v141_v10 }
  0xa3   :  { %v661_v4 = vpop.f32.mrf.mxu1 }
  0xa4   :  { %v662_v14 = vadd.f32 %v661_v4, %v649_v12 }
  0xa7   :  { %v674_v5 = vpop.f32.mrf.mxu2 }
  0xa8   :  { %v687_v7 = vpop.f32.mrf.mxu3  ;;  %v650_v8 = vpop.f32.mrf.mxu0  ;;  %v675_v16 = vadd.f32 %v674_v5, %v662_v14  ;;  %v1685_v5 = vld [vmem:[%s2466_s5] sm:$0xff] }
  0xa9   :  { %1060 = vmatpush.bf16.msrb.mxu0 %v1685_v5 }
  0xaa   :  { %v688_v18 = vadd.f32 %v687_v7, %v675_v16  ;;  %v1066_v16 = vlaneseq }
  0xab   :  { %v663_v9 = vpop.f32.mrf.mxu1 }
  0xaf   :  { %v676_v11 = vpop.f32.mrf.mxu2 }
  0xb0   :  { %v689_v13 = vpop.f32.mrf.mxu3 }
  0xb1   :  { %v1694_v13 = vld [vmem:[%s2465_s6] ss:$0 sm:$0xff] }
  0xb7   :  { %v726_v15 = vpop.f32.mrf.mxu2 }
  0xbf   :  { %v728_v21 = vpop.f32.mrf.mxu2 }
  0xc0   :  { %v700_v19 = vpop.f32.mrf.mxu0 }
  0xc1   :  { %v701_v20 = vadd.f32 %v700_v19, %v688_v18  ;;  %v1067_v18 = vand.u32 127, %v1066_v16 }
  0xc3   :  { %v713_v23 = vpop.f32.mrf.mxu1  ;;  %vm1068_vm1 = vcmp.ge.s32.totalorder %v1067_v18, 16  ;;  %vm1069_vm2 = vcmp.lt.s32.totalorder %v1067_v18, 32 }
  0xc4   :  { %v714_v24 = vadd.f32 %v713_v23, %v701_v20  ;;  %vm1070_vm3 = vmand %vm1068_vm1, %vm1069_vm2 }
  0xc6   :  { %v727_v25 = vadd.f32 %v726_v15, %v714_v24 }
  0xc8   :  { %v821_v27 = vmax.f32 %v727_v25, 0.0  ;;  %v702_v28 = vpop.f32.mrf.mxu0  ;;  %v739_v33 = vpop.f32.mrf.mxu3 }
  0xc9   :  { %v740_v48 = vadd.f32 %v739_v33, %v142_v45 }
  0xca   :  { %v823_v31 = vpack.c.bf16 %v821_v27, %v821_v27 }
  0xcb   :  { %v752_v32 = vpop.f32.mrf.mxu2  ;;  %v715_v34 = vpop.f32.mrf.mxu1 }
  0xcc   :  { %965 = vmatmul.bf16.vlgmr.msrb.gmra.mxu1 %v823_v31  ;;  %v753_v52 = vadd.f32 %v752_v32, %v740_v48 }
  0xd0   :  { %v741_v39 = vpop.f32.mrf.mxu3 }
  0xd3   :  { %v754_v38 = vpop.f32.mrf.mxu2 }
  0xe0   :  { %v765_v42 = vpop.f32.mrf.mxu0 }
  0xe1   :  { %v766_v53 = vadd.f32 %v765_v42, %v753_v52 }
  0xe3   :  { %v778_v44 = vpop.f32.mrf.mxu1 }
  0xe4   :  { %v779_v57 = vadd.f32 %v778_v44, %v766_v53 }
  0xe8   :  { %v791_v46 = vpop.f32.mrf.mxu3  ;;  %v767_v47 = vpop.f32.mrf.mxu0 }
  0xe9   :  { %v792_v58 = vadd.f32 %v791_v46, %v779_v57 }
  0xeb   :  { %v804_v49 = vpop.f32.mrf.mxu2  ;;  %v780_v50 = vpop.f32.mrf.mxu1 }
  0xec   :  { %v805_v59 = vadd.f32 %v804_v49, %v792_v58 }
  0xf0   :  { %v793_v54 = vpop.f32.mrf.mxu3 }
  0xf3   :  { %v806_v55 = vpop.f32.mrf.mxu2 }
  0xfb   :  { %v817_v60 = vpop.f32.mrf.mxu2 }
  0xfc   :  { %v818_v61 = vadd.f32 %v817_v60, %v805_v59 }
  0xfe   :  { %v822_v1 = vmax.f32 %v818_v61, 0.0 }
 0x100   :  { %v824_v62 = vpack.c.bf16 %v822_v1, %v822_v1 }
 0x102   :  { %978 = vmatmul.bf16.vlgmr.msrb.gmra.mxu3 %v824_v62 }
 0x103   :  { %v819_v63 = vpop.f32.mrf.mxu2 }
 0x149   :  { %v966_v3 = vpop.f32.mrf.mxu1 }
 0x14a   :  { %v967_v7 = vadd.f32 %v1693_v6, %v966_v3 }
 0x151   :  { %v968_v4 = vpop.f32.mrf.mxu1 }
 0x185   :  { %v979_v8 = vpop.f32.mrf.mxu3 }
 0x186   :  { %v980_v9 = vadd.f32 %v979_v8, %v967_v7 }
 0x188   :  { %v983_v10 = vmax.f32 %v980_v9, 0.0 }
 0x18a   :  { %v984_v11 = vpack.c.bf16 %v983_v10, %v983_v10 }
 0x18c   :  { %1061 = vmatmul.bf16.vlgmr.msrb.gmra.mxu0 %v984_v11 }
 0x18d   :  { %v981_v12 = vpop.f32.mrf.mxu3 }
 0x209   :  { %v1062_v14 = vpop.f32.mrf.mxu0 }
 0x20a   :  { %v1063_v15 = vadd.f32 %v1694_v13, %v1062_v14 }
 0x20c   :  { %v1071_v17 = vmul.f32 1.442695, %v1063_v15 }
 0x20e   :  { %1695 = vpow2.f32 %v1071_v17 }
 0x211   :  { %v1064_v19 = vpop.f32.mrf.mxu0 }
 0x214   :  { %v1696_v20 = vpop.eup %1695 }
 0x215   :  { %v1073_v21 = vmax.f32 %v1696_v20, 1e-05 }
 0x217   :  { %v1074_v22 = vmin.f32 %v1073_v21, 100000.0 }
 0x219   :  { %v1075_v23 = vsel %vm1070_vm3, %v1074_v22, %v1063_v15 }
 0x21a   :  { %1076 = vst [vmem:[%s2467_s7] sm:$0xff] %v1075_v23 }

</bundles_post_ra>
